<compile_context>
chip_gen: v6e
topology: v6e:2x2x1
jax: 0.10.0
libtpu: 0.0.40
codegen_flags: <defaults>
</compile_context>

<pallas_src>
import jax
import jax.numpy as jnp
from jax.experimental import pallas as pl
from jax.experimental.pallas import tpu as pltpu

EPS = 1e-5


def prenorm_linear_kernel(x_ref, w_ref, b_ref, o_ref):
    # x_ref: (TR, D)   w_ref: (D, TN)   b_ref: (1, TN) f32   o_ref: (TR, TN)
    x = x_ref[...].astype(jnp.float32)
    # One-pass LayerNorm statistics (biased variance, matches nn.LayerNorm).
    mean = jnp.mean(x, axis=-1, keepdims=True)
    mean_sq = jnp.mean(x * x, axis=-1, keepdims=True)
    var = jnp.maximum(mean_sq - mean * mean, 0.0)
    inv = jax.lax.rsqrt(var + EPS)
    # gamma/beta were folded into w/bias at param-prep time; only rsqrt-scale here.
    normed = ((x - mean) * inv).astype(w_ref.dtype)
    y = jnp.dot(normed, w_ref[...], preferred_element_type=jnp.float32) + b_ref[...]
    o_ref[...] = y.astype(o_ref.dtype)


def prenorm_linear_prepare(gamma, beta, w, bias, *, compute_dtype=None):
    """One-time parameter prep (call once, reuse every forward).

    Folds the LayerNorm affine into the Linear layer:
        W' = gamma[:, None] * W        b' = beta @ W + bias
    and pads the output dim to a lane-dense width.  `w` is laid out (in, out).
    Pass compute_dtype=jnp.bfloat16 to run the MXU at bf16 rate (f32 accumulate).
    """
    d_in, d_out = w.shape
    w32 = w.astype(jnp.float32)
    w_f = gamma.astype(jnp.float32)[:, None] * w32
    b_f = beta.astype(jnp.float32) @ w32 + bias.astype(jnp.float32)
    w_f = w_f.astype(compute_dtype if compute_dtype is not None else w.dtype)

    lane_mult = 256 if d_out >= 256 else 128          # v6e/v7x MXU is 256 wide
    d_pad = lane_mult * pl.cdiv(d_out, lane_mult)
    if d_pad != d_out:
        w_f = jnp.pad(w_f, ((0, 0), (0, d_pad - d_out)))
        b_f = jnp.pad(b_f, ((0, d_pad - d_out),))
    b_f = b_f.reshape(1, d_pad).astype(jnp.float32)
    return w_f, b_f, d_out


def prenorm_linear_apply(x, w_f, b_f, d_out, *, row_tile=512, n_tile=None):
    """x: (B, S, D).  w_f/b_f from prenorm_linear_prepare.  Returns (B, S, d_out)."""
    B, S, D = x.shape
    D_pad = w_f.shape[1]
    R = B * S
    x2 = x.reshape(R, D)

    # Sublane packing: 8 rows for 32-bit, 16 for 16-bit, 32 for 8-bit dtypes.
    itemsize = jnp.dtype(x.dtype).itemsize
    sublane = {4: 8, 2: 16, 1: 32}.get(itemsize, 8)

    # Row tile: multiple of sublane, clamped so the row grid has >= 2 steps
    # whenever R allows it (v7x has 2 TCs sharded over "parallel" axes, and a
    # >=2-step grid is needed for input/output pipelining anyway).
    cap = sublane * max(1, pl.cdiv(pl.cdiv(R, 2), sublane))
    row_tile = max(sublane, min(sublane * pl.cdiv(row_tile, sublane), cap))
    num_row_tiles = pl.cdiv(R, row_tile)              # ragged last block is fine

    # N tiling keeps the weight block VMEM-safe for large D (v7x: 64 MiB VMEM).
    if n_tile is None:
        n_tile = D_pad if D_pad <= 1024 else 512
    n_tile = 128 * pl.cdiv(min(n_tile, D_pad), 128)
    num_n_tiles = pl.cdiv(D_pad, n_tile)
    resident = num_n_tiles == 1                       # weight fits one tile -> keep resident

    if resident:
        w_spec = pl.BlockSpec((D, n_tile), lambda i, j: (0, j),
                              pipeline_mode=pl.Buffered(1))
        b_spec = pl.BlockSpec((1, n_tile), lambda i, j: (0, j),
                              pipeline_mode=pl.Buffered(1))
    else:
        w_spec = pl.BlockSpec((D, n_tile), lambda i, j: (0, j))
        b_spec = pl.BlockSpec((1, n_tile), lambda i, j: (0, j))

    w_bytes = w_f.size * jnp.dtype(w_f.dtype).itemsize
    bytes_accessed = (x2.size * itemsize
                      + w_bytes * (1 if resident else num_row_tiles)
                      + b_f.size * 4
                      + R * D_pad * itemsize)

    out = pl.pallas_call(
        prenorm_linear_kernel,
        out_shape=jax.ShapeDtypeStruct((R, D_pad), x.dtype),
        grid_spec=pltpu.PrefetchScalarGridSpec(
            num_scalar_prefetch=0,
            grid=(num_row_tiles, num_n_tiles),
            in_specs=[
                pl.BlockSpec((row_tile, D), lambda i, j: (i, 0)),   # x rows
                w_spec,                                             # folded weight
                b_spec,                                             # folded bias (f32)
            ],
            out_specs=pl.BlockSpec((row_tile, n_tile), lambda i, j: (i, j)),
        ),
        compiler_params=pltpu.CompilerParams(
            # Both axes are independent; leave the default scoped VMEM limit
            # (blocks are sized to fit it; raise vmem_limit_bytes only if needed).
            dimension_semantics=("parallel", "parallel"),
        ),
        cost_estimate=pl.CostEstimate(
            flops=2 * R * D * D_pad,
            transcendentals=R,
            bytes_accessed=bytes_accessed,
        ),
    )(x2, w_f, b_f)

    return out[:, :d_out].reshape(B, S, d_out)


if __name__ == "__main__":
    key = jax.random.PRNGKey(0)
    B, S, D = 2, 8, 32

    kx, kw, kb = jax.random.split(key, 3)
    x = jax.random.normal(kx, (B, S, D), dtype=jnp.float32)

    # LayerNorm params: PyTorch init -> weight = 1, bias = 0
    gamma = jnp.ones((D,), dtype=jnp.float32)
    beta = jnp.zeros((D,), dtype=jnp.float32)

    # fn = Linear(D, D); stored as (in, out) so the kernel computes
    # normed @ w + b, equivalent to PyTorch's normed @ W.T + b.
    # TODO(synk): `fn` is arbitrary in PreNorm; only the Linear instantiation is fused here.
    w = jax.random.normal(kw, (D, D), dtype=jnp.float32) * 0.02
    bias = jax.random.normal(kb, (D,), dtype=jnp.float32) * 0.02

    # --- One-time param prep (fold + pad), then the per-call fused kernel. ---
    w_f, b_f, d_out = prenorm_linear_prepare(gamma, beta, w, bias)
    fwd = jax.jit(lambda xx: prenorm_linear_apply(xx, w_f, b_f, d_out))
    out = jax.block_until_ready(fwd(x))

    # Pure-JAX reference of LayerNorm + Linear.
    mean = jnp.mean(x, axis=-1, keepdims=True)
    var = jnp.mean((x - mean) ** 2, axis=-1, keepdims=True)
    normed = (x - mean) * jax.lax.rsqrt(var + EPS) * gamma + beta
    ref = normed @ w + bias
    assert jnp.allclose(out, ref, atol=1e-4, rtol=1e-4), "mismatch vs reference (f32)"

    # bf16 weight path (MXU bf16 rate, f32 accumulation) -> looser tolerance.
    w_bf, b_bf, _ = prenorm_linear_prepare(gamma, beta, w, bias, compute_dtype=jnp.bfloat16)
    out_bf = jax.block_until_ready(prenorm_linear_apply(x, w_bf, b_bf, d_out))
    assert jnp.allclose(out_bf, ref, atol=5e-2, rtol=5e-2), "mismatch vs reference (bf16)"

    print("KERNEL_OK")
</pallas_src>

<mosaic_0001>
module attributes {stable_mosaic.version = 11 : i64} {
  func.func @prenorm_linear_kernel(%arg0: i32, %arg1: i32, %arg2: memref<8x32xf32, #tpu.memory_space<vmem>>, %arg3: memref<32x128xf32, #tpu.memory_space<vmem>>, %arg4: memref<1x128xf32, #tpu.memory_space<vmem>>, %arg5: memref<8x128xf32, #tpu.memory_space<vmem>>) attributes {dimension_semantics = [#tpu.dimension_semantics<parallel>, #tpu.dimension_semantics<parallel>], iteration_bounds = array<i64: 2, 1>, scalar_prefetch = 0 : i64, scratch_operands = 0 : i64, tpu.core_type = #tpu.core_type<tc>, window_params = [{transform_indices = @transform_0, window_bounds = array<i64: 8, 32>}, {pipeline_mode = #tpu.pipeline_mode<synchronous>, transform_indices = @transform_1, window_bounds = array<i64: 32, 128>}, {pipeline_mode = #tpu.pipeline_mode<synchronous>, transform_indices = @transform_2, window_bounds = array<i64: 1, 128>}, {transform_indices = @transform_3, window_bounds = array<i64: 8, 128>}]} {
    %c0 = arith.constant 0 : index
    %c0_0 = arith.constant 0 : index
    %0 = vector.load %arg2[%c0, %c0_0] : memref<8x32xf32, #tpu.memory_space<vmem>>, vector<8x32xf32>
    %cst = arith.constant dense<0.000000e+00> : vector<8xf32>
    %1 = vector.multi_reduction <add>, %0, %cst [1] : vector<8x32xf32> to vector<8xf32>
    %2 = vector.shape_cast %1 : vector<8xf32> to vector<8x1xf32>
    %cst_1 = arith.constant 3.200000e+01 : f32
    %3 = vector.broadcast %cst_1 : f32 to vector<8x1xf32>
    %4 = arith.divf %2, %3 : vector<8x1xf32>
    %5 = arith.mulf %0, %0 : vector<8x32xf32>
    %cst_2 = arith.constant dense<0.000000e+00> : vector<8xf32>
    %6 = vector.multi_reduction <add>, %5, %cst_2 [1] : vector<8x32xf32> to vector<8xf32>
    %7 = vector.shape_cast %6 : vector<8xf32> to vector<8x1xf32>
    %cst_3 = arith.constant 3.200000e+01 : f32
    %8 = vector.broadcast %cst_3 : f32 to vector<8x1xf32>
    %9 = arith.divf %7, %8 : vector<8x1xf32>
    %10 = arith.mulf %4, %4 : vector<8x1xf32>
    %11 = arith.subf %9, %10 : vector<8x1xf32>
    %cst_4 = arith.constant 0.000000e+00 : f32
    %12 = vector.broadcast %cst_4 : f32 to vector<8x1xf32>
    %13 = arith.maximumf %11, %12 : vector<8x1xf32>
    %cst_5 = arith.constant 9.99999974E-6 : f32
    %14 = vector.broadcast %cst_5 : f32 to vector<8x1xf32>
    %15 = arith.addf %13, %14 : vector<8x1xf32>
    %16 = math.rsqrt %15 : vector<8x1xf32>
    %17 = vector.broadcast %4 : vector<8x1xf32> to vector<8x32xf32>
    %18 = arith.subf %0, %17 : vector<8x32xf32>
    %19 = vector.broadcast %16 : vector<8x1xf32> to vector<8x32xf32>
    %20 = arith.mulf %18, %19 : vector<8x32xf32>
    %c0_6 = arith.constant 0 : index
    %c0_7 = arith.constant 0 : index
    %21 = vector.load %arg3[%c0_6, %c0_7] : memref<32x128xf32, #tpu.memory_space<vmem>>, vector<32x128xf32>
    %cst_8 = arith.constant dense<0.000000e+00> : vector<8x128xf32>
    %22 = tpu.matmul %20, %21, %cst_8 {dimension_numbers = #tpu.dot_dimension_numbers<[1], [0], [0], [1], [0, 0, 1, 1], [], []>} : vector<8x32xf32>, vector<32x128xf32>, vector<8x128xf32> -> vector<8x128xf32>
    %c0_9 = arith.constant 0 : index
    %c0_10 = arith.constant 0 : index
    %23 = vector.load %arg4[%c0_9, %c0_10] : memref<1x128xf32, #tpu.memory_space<vmem>>, vector<1x128xf32>
    %24 = vector.broadcast %23 : vector<1x128xf32> to vector<8x128xf32>
    %25 = arith.addf %22, %24 : vector<8x128xf32>
    %c0_11 = arith.constant 0 : index
    %c0_12 = arith.constant 0 : index
    %26 = vector.load %arg5[%c0_11, %c0_12] : memref<8x128xf32, #tpu.memory_space<vmem>>, vector<8x128xf32>
    tpu.vector_store %arg5[%c0_11, %c0_12], %25 {strides = array<i32>} : memref<8x128xf32, #tpu.memory_space<vmem>>, vector<8x128xf32>,
    return
  }
  func.func @transform_0(%arg0: i32, %arg1: i32) -> (i32, i32) {
    %c0_i32 = arith.constant 0 : i32
    %c0_i32_0 = arith.constant 0 : i32
    return %arg0, %c0_i32 : i32, i32
  }
  func.func @transform_1(%arg0: i32, %arg1: i32) -> (i32, i32) {
    %c0_i32 = arith.constant 0 : i32
    %c0_i32_0 = arith.constant 0 : i32
    return %c0_i32, %arg1 : i32, i32
  }
  func.func @transform_2(%arg0: i32, %arg1: i32) -> (i32, i32) {
    %c0_i32 = arith.constant 0 : i32
    %c0_i32_0 = arith.constant 0 : i32
    return %c0_i32, %arg1 : i32, i32
  }
  func.func @transform_3(%arg0: i32, %arg1: i32) -> (i32, i32) {
    %c0_i32 = arith.constant 0 : i32
    return %arg0, %arg1 : i32, i32
  }
}

</mosaic_0001>

<bundles_post_ra>
// kernel: _lambda_.1
= control target key start
LH: loop header
LB: loop body
LE: loop exit
PB: predicated region body
PF: predicated region fallthrough
CT: control target
= control target key end

     0   :  { %8 = vsyncpa [#allocation3], 0  ;;  %s820_s0 = inlined_call_operand.hbm [shape: f32[16,32], index: 0, kind: input, shape index: {}]   ;;  %s821_s1 = inlined_call_operand.hbm [shape: f32[32,128], index: 1, kind: input, shape index: {}]   ;;  %s822_s2 = inlined_call_operand.vmem [shape: f32[1,128], index: 2, kind: input, shape index: {}]   ;;  %s823_s3 = inlined_call_operand.vmem [shape: f32[16,128], index: 3, kind: output, shape index: {}]  }
   0x1   :  { %10 = vsyncpa [#allocation3 + $0x1], 0 }
   0x2   :  { %11 = vsyncpa [#allocation5], 0  ;;  %s693_s12 = smov 0   ;;  %s695_s13 = smov 0  }
   0x3   :  { %s697_s14 = smov 0   ;;  %s699_s15 = smov 0  }
   0x4   :  { %s701_s16 = smov 0   ;;  %s703_s17 = smov 0  }
   0x5 LB: > { %s453_s18 = sadd.s32 4294967295, %s665_s17   ;;  %p49_p0 = scmp.ne.s32.totalorder %s649_s13, %s645_s12  ;;  %s665_s17 = sphi %s703_s17, %s17_s17   ;;  %s661_s16 = sphi %s701_s16, %s833_s16   ;;  %s657_s15 = sphi %s699_s15, %s832_s15   ;;  %s653_s14 = sphi %s697_s14, %s831_s14   ;;  %s649_s13 = sphi %s695_s13, %s830_s13   ;;  %s645_s12 = sphi %s693_s12, %s829_s12  }
   0x6   : > { %p723_p1 = scmp.eq.s32.totalorder %s453_s18, 0  ;;  %p455_p2 = scmp.ge.s32.totalorder %s665_s17, 1 }
   0x7   : > { %p140_p3 = scmp.lt.s32.totalorder %s665_s17, 3  ;;  %s667_s22 = smov [#allocation4]  }
   0x8   : > { %p731_p4 = por %p723_p1, %p49_p0  ;;  %s154_s23 = sshll.u32 %s667_s22, 4  ;;  %s155_s23 = int_to_ptr.vmem [resolvable:$true] %s154_s23 }
   0x9   : > { %p735_p5 = pnand %p455_p2, %p140_p3  ;;  %s29_s25 = sadd.s32 1, %s661_s16 }
   0xa   : > { %s568_s26 = scalar_lea.vmem %s155_s23, 512  ;;  %p576_p12 = scmp.lt.s32.totalorder %s155_s23, %s155_s23 }
   0xb   : > { %p491_p6 = pneg %p735_p5  ;;  %p569_p9 = scmp.ne.s32.totalorder %s155_s23, %s568_s26 }
   0xc   : > { %p577_p13 = scmp.lt.s32.totalorder %s568_s26, %s568_s26 }
   0xd   : > { %p743_p7 = pnand %p491_p6, %p723_p1 }
   0xe   : > { %p578_p0 = por %p577_p13, %p576_p12 }
   0xf   : > { %p559_p8 = pneg %p743_p7 }
  0x11   : > { %p571_p10 = pnand %p569_p9, %p559_p8 }
  0x13   : > { %p572_p11 = pneg %p571_p10 }
  0x15   : > { %p579_p2 = pnand %p578_p0, %p572_p11 }
  0x17   : > { %582 = shalt.err (!%p579_p2)
}
  0x18   : > { %s668_s27 = smov 128   ;;  %s669_s28 = smov 8  }
  0x19   : > { %494 = dma.hbm_to_vmem [thread:$0]  (!%p743_p7), %s821_s1, 512, %s155_s23, [#allocation5], %s668_s27, %s668_s27, %s669_s28  }
  0x1a   : > { %p31_p3 = scmp.ge.s32.totalorder %s29_s25, 2  ;;  %s36_s4 = sadd.s32 1, %s653_s14 }
  0x1b   : > { %p43_p6 = scmp.ne.s32.totalorder %s653_s14, %s649_s13  ;;  %p44_p8 = scmp.eq.s32.totalorder %s665_s17, 0 }
  0x1c   : > { %s835_s25 = smov (%p31_p3, %s29_s25), 0  ;;  %p500_p10 = scmp.lt.s32.totalorder %s665_s17, 2 }
  0x1d   : > { %p45_p9 = por %p44_p8, %p43_p6  ;;  %s33_s5 = ssub.s32 %s661_s16, %s835_s25 }
  0x1e   : > { %s174_s6 = sand.u32 1, %s653_s14   ;;  %p34_p11 = scmp.eq.s32.totalorder %s33_s5, 0 }
  0x1f   : > { %s459_s7 = sshll.u32 %s174_s6, 3  ;;  %s460_s8 = sshll.u32 %s661_s16, 7 }
  0x20   : > { %s767_s9 = scalar_select %p34_p11, %s653_s14, %s36_s4  }
  0x21   : > { %s183_s12 = scalar_lea.hbm %s820_s0, %s460_s8  ;;  %s178_s18 = scalar_lea.vmem [#allocation2], %s459_s7 }
  0x22   : > { %s185_s22 = sshll.u32 %s178_s18, 4  ;;  %p772_p7 = pnand %p500_p10, %p45_p9  ;;  %s186_s22 = int_to_ptr.vmem [resolvable:$true] %s185_s22 }
  0x23   : > { %s175_s24 = scalar_lea.sflag [#allocation3], %s174_s6  ;;  %s596_s26 = scalar_lea.vmem %s186_s22, 128 }
  0x24   : > { %p585_p12 = pneg %p772_p7  ;;  %p597_p13 = scmp.ne.s32.totalorder %s186_s22, %s596_s26 }
  0x25   : > { %s670_s27 = smov [#allocation2]  }
  0x26   : > { %p599_p0 = pnand %p597_p13, %p585_p12  ;;  %s601_s28 = sshll.u32 %s670_s27, 4  ;;  %s602_s28 = int_to_ptr.vmem [resolvable:$false] %s601_s28 }
  0x27   : > { %s603_s29 = scalar_lea.vmem %s602_s28, 256  ;;  %p604_p3 = scmp.lt.s32.totalorder %s186_s22, %s602_s28 }
  0x28   : > { %p600_p2 = pneg %p599_p0  ;;  %p605_p6 = scmp.lt.s32.totalorder %s603_s29, %s596_s26 }
  0x2a   : > { %p606_p8 = por %p605_p6, %p604_p3 }
  0x2c   : > { %p607_p9 = pnand %p606_p8, %p600_p2 }
  0x2e   : > { %610 = shalt.err (!%p607_p9)
}
  0x2f   : > { %498 = dma.hbm_to_vmem [thread:$0]  (!%p772_p7), %s183_s12, 128, %s186_s22, %s175_s24  }
  0x30   : > { %194 = sbr.rel (%p735_p5) target bundleno = 420 (0x1a4), region = 32  ;;  %s196_s30 = sand.u32 (!%p735_p5), 1, %s649_s13  }
  0x31   : > { %s462_s4 = sshll.u32 (!%p735_p5), %s196_s30, 3  ;;  %s197_s5 = scalar_lea.sflag (!%p735_p5), [#allocation3], %s196_s30 }
  0x32   : > { %s200_s6 = scalar_lea.vmem (!%p735_p5), [#allocation2], %s462_s4 }
  0x35   : > { %636 = dma.done.wait (%p731_p4), %s197_s5, 128  }
  0x36   : > { %638 = vsyncadd (%p731_p4), %s197_s5, 4294967168 }
  0x37   : > { %640 = dma.done.wait (%p723_p1), [#allocation5], 512  }
  0x38   : > { %642 = vsyncadd (%p723_p1), [#allocation5], 4294966784  ;;  %vm243_vm0 = vcmask 261120   ;;  %v242_v0 = vld [vmem:[%s200_s6] sm:$0xff]  ;;  %v671_v5 = vmov 0.0   ;;  %vm672_vm1 = vmmov 0  }
  0x39   : > { %v244_v1 = vsel %vm243_vm0, %v242_v0, 0.0  ;;  %v249_v2 = vmul.f32 %v242_v0, %v242_v0  ;;  %v264_v4 = vld [vmem:[#allocation4 + $0x18] sm:$0xff]  ;;  %474 = vmatprep.subr.mxu0 %v671_v5  ;;  %v263_v6 = vld [vmem:[#allocation4 + $0x10] sm:$0xff]  ;;  %482 = vmatprep.mubr.msk.f32.mxu0 %vm672_vm1, %v671_v5  ;;  %v262_v7 = vld [vmem:[#allocation4 + $0x8] sm:$0xff]  ;;  %p235_p1 = scmp.lt.s32.totalorder %s657_s15, 1 }
  0x3a   : > { %245 = vadd.xlane.f32.xlu0 %v244_v1  ;;  %475 = vmatpush3.msra.mxu0 %v264_v4  ;;  %v261_v8 = vld [vmem:[#allocation4] sm:$0xff]  ;;  %v465_v20 = vld [vmem:[%s822_s2] ss:$0 sm:$0xff] }
  0x3b   : > { %v250_v3 = vsel %vm243_vm0, %v249_v2, 0.0  ;;  %476 = vmatprep.subr.mxu0 %v671_v5  ;;  %s837_s15 = smov (!%p235_p1, %s657_s15), 1 }
  0x3c   : > { %477 = vmatpush3.msra.mxu0 %v263_v6  ;;  %s464_s19 = sshll.u32 %s837_s15, 3 }
  0x3d   : > { %478 = vmatprep.subr.mxu0 %v671_v5  ;;  %s241_s10 = scalar_lea.vmem %s823_s3, %s464_s19 }
  0x3e   : > { %251 = vadd.xlane.f32.xlu0 %v250_v3  ;;  %479 = vmatpush3.msra.mxu0 %v262_v7 }
  0x3f   : > { %480 = vmatprep.subr.mxu0 %v671_v5 }
  0x40   : > { %481 = vmatpush3.msra.mxu0 %v261_v8 }
  0xc3   : > { %v246_v9 = vpop.xlane.xlu0 %245 }
  0xc4   : > { %v248_v10 = vmul.f32 0.03125, %v246_v9 }
  0xc6   : > { %v254_v12 = vmul.f32 %v248_v10, %v248_v10  ;;  %v259_v17 = vsub.f32 %v242_v0, %v248_v10 }
  0xc7   : > { %v252_v11 = vpop.xlane.xlu0 %251 }
  0xc8   : > { %v253_v13 = vmul.f32 0.03125, %v252_v11 }
  0xca   : > { %v255_v14 = vsub.f32 %v253_v13, %v254_v12 }
  0xcc   : > { %v256_v15 = vmax.f32 %v255_v14, 0.0 }
  0xce   : > { %v257_v16 = vadd.f32 1e-05, %v256_v15 }
  0xd0   : > { %555 = vrsqrt.f32 %v257_v16 }
  0xdd   : > { %v556_v18 = vpop.eup %555 }
  0xde   : > { %v260_v19 = vmul.f32 %v556_v18, %v259_v17 }
  0xe0   : > { %483 = vmatmul.mubr.msk.f32.vlgmr.msra.gmra.mxu0 %vm243_vm0, %v260_v19 }
 0x1a0   : > { %v341_v21 = vpop.f32.mrf.mxu0 }
 0x1a1   : > { %v342_v22 = vadd.f32 %v465_v20, %v341_v21 }
 0x1a2   : > { %v484_v23 = vpop.f32.mrf.mxu0 }
 0x1a3   : > { %345 = vst [vmem:[%s241_s10] sm:$0xff] %v342_v22 }
 0x1a4 PF: > { %s17_s17 = sadd.s32 1, %s665_s17   ;;  %s829_s12 = smov %s649_s13 }
 0x1a5   : > { %p14_p4 = scmp.ge.s32.totalorder %s17_s17, 4   ;;  %s830_s13 = smov %s653_s14 }
 0x1a6   : > { %s831_s14 = smov %s767_s9  ;;  %s832_s15 = smov %s661_s16 }
 0x1a7   : > { %s833_s16 = smov %s835_s25  ;;  %16 = sbr.rel (!%p14_p4) target bundleno = 5 (0x5), region = 80 }
 0x1ac   :  { %371 = vsyncpa [#allocation3], 1 }
 0x1ad   :  { %373 = vsyncpa [#allocation3 + $0x1], 1 }
 0x1ae   :  { %374 = vsyncpa [#allocation5], 1 }

</bundles_post_ra>
